<compile_context>
chip_gen: v6e
topology: v6e:2x2x1
jax: 0.10.0
libtpu: 0.0.40
codegen_flags: <defaults>
</compile_context>

<pallas_src>
import math

import jax
import jax.numpy as jnp
from jax.experimental import pallas as pl
from jax.experimental.pallas import tpu as pltpu


_SMALL_BYTES = 256 * 1024  # below this, pallas_call launch cost dominates


def _dma_copy_kernel(x_hbm, o_hbm, sem):
    # Whole-tensor HBM->HBM DMA: single descriptor, streams at HBM bandwidth.
    cp = pltpu.make_async_copy(x_hbm, o_hbm, sem)
    cp.start()
    cp.wait()


def reshape_forward(x, shape, *, force_kernel=False):
    """Equivalent of Reshape(shape).forward(x) = x.view(x.size(0), *shape)."""
    b = x.shape[0]
    n = math.prod(x.shape[1:]) if x.ndim > 1 else 1
    target_n = math.prod(shape)
    assert n == target_n, f"cannot view {x.shape} as ({b}, *{shape})"
    out_shape = (b, *shape)

    nbytes = b * n * jnp.dtype(x.dtype).itemsize
    if not force_kernel and nbytes < _SMALL_BYTES:
        # Metadata-only path: the generally optimal implementation of this op.
        return jnp.reshape(x, out_shape)

    # Attach the requested view shape up front (wrapper-side glue) so the
    # kernel is a same-shape whole-buffer copy.
    x_view = jnp.reshape(x, out_shape)

    return pl.pallas_call(
        _dma_copy_kernel,
        out_shape=jax.ShapeDtypeStruct(out_shape, x.dtype),
        in_specs=[pl.BlockSpec(memory_space=pl.ANY)],
        out_specs=pl.BlockSpec(memory_space=pl.ANY),
        scratch_shapes=[pltpu.SemaphoreType.DMA(())],
        cost_estimate=pl.CostEstimate(
            flops=0,
            transcendentals=0,
            bytes_accessed=2 * nbytes,
        ),
    )(x_view)


if __name__ == "__main__":
    key = jax.random.PRNGKey(0)
    # Input: (batch=2, channels=4, H=16, W=16) -- NCHW, as PyTorch would feed.
    x = jax.random.normal(key, (2, 4, 16, 16), dtype=jnp.float32)

    # Reshape module configured with shape=(16, 64): 4*16*16 == 16*64 == 1024.
    target_shape = (16, 64)

    # force_kernel=True so the Pallas DMA kernel is actually exercised on TPU
    # even though the demo tensor is small enough for the metadata bypass.
    out = reshape_forward(x, target_shape, force_kernel=True)
    out = jax.block_until_ready(out)

    # Correctness check against the pure-JAX reference of x.view(B, *shape).
    ref = jnp.reshape(x, (x.shape[0], *target_shape))
    assert out.shape == (2, 16, 64), out.shape
    assert out.dtype == x.dtype
    assert bool(jnp.all(out == ref))

    # Also exercise the small-tensor metadata-only bypass path.
    out2 = jax.block_until_ready(reshape_forward(x, target_shape))
    assert out2.shape == (2, 16, 64)
    assert bool(jnp.all(out2 == ref))

    print("KERNEL_OK")
</pallas_src>

<mosaic_0001>
module attributes {stable_mosaic.version = 11 : i64} {
  func.func @_dma_copy_kernel(%arg0: memref<2x16x64xf32, #tpu.memory_space<any>>, %arg1: memref<2x16x64xf32, #tpu.memory_space<any>>, %arg2: memref<!tpu.dma_semaphore, #tpu.memory_space<semaphore_mem>>) attributes {dimension_semantics = [], scalar_prefetch = 0 : i64, scratch_operands = 1 : i64, tpu.core_type = #tpu.core_type<tc>} {
    tpu.enqueue_dma source(%arg0 : memref<2x16x64xf32, #tpu.memory_space<any>>) target(%arg1 : memref<2x16x64xf32, #tpu.memory_space<any>>) target_semaphore(%arg2 : memref<!tpu.dma_semaphore, #tpu.memory_space<semaphore_mem>>)
    tpu.wait_dma2 semaphore(%arg2 : memref<!tpu.dma_semaphore, #tpu.memory_space<semaphore_mem>>) src(%arg0 : memref<2x16x64xf32, #tpu.memory_space<any>>) dst(%arg1 : memref<2x16x64xf32, #tpu.memory_space<any>>)
    return
  }
}

</mosaic_0001>

<bundles_post_ra>
// kernel: tpu_custom_call.1
= control target key start
LH: loop header
LB: loop body
LE: loop exit
PB: predicated region body
PF: predicated region fallthrough
CT: control target
= control target key end

     0   :  { %s29_s6 = smov [#allocation2]   ;;  %s30_s7 = smov 131072   ;;  %s48_s0 = inlined_call_operand.hbm [shape: f32[2,16,64], index: 0, kind: input, shape index: {}]   ;;  %s49_s1 = inlined_call_operand.hbm [shape: f32[2,16,64], index: 1, kind: output, shape index: {}]  }
   0x1   :  { %s31_s8 = smov 0  }
   0x2   :  { %12 = dma.general %s48_s0, 512, %s49_s1, %s29_s6, %s30_s7, [#allocation4], %s31_s8, 0  }
   0x3   :  { %27 = dma.done.wait [#allocation2], 512 }
   0x4   :  { %28 = vsyncadd [#allocation2], 4294966784 }
   0x5   :  { %17 = vsyncmov [#allocation2] }
   0x8   :  { %s18_s13 = vpop.sfrf %17 }
   0x9   :  { %p23_p0 = scmp.ne.s32.totalorder %s18_s13, 0 }
   0xb   :  { %22 = shalt.err (%p23_p0)  }

</bundles_post_ra>
